<compile_context>
chip_gen: v7x
topology: tpu7x:2x2x1
jax: 0.10.0
libtpu: 0.0.40
codegen_flags: <defaults>
</compile_context>

<pallas_src>
import jax
import jax.numpy as jnp
from jax.experimental import pallas as pl
from jax.experimental.pallas import tpu as pltpu


def _yolo_decode_kernel(pred_ref, off_ref, escale_ref, lscale_ref, out_ref):
    """Full-tile YOLO box decode for a (chunk, A*C5, tGG) block.

    pred_ref  : VMEM (chunk, R, tGG)  raw conv outputs (f32 or bf16)
    off_ref   : VMEM (R, tGG) f32     additive offsets (gx*stride / gy*stride rows, else 0)
    escale_ref: VMEM (R, 1)  f32      exp-path scale (anchor w/h rows, else 0)
    lscale_ref: VMEM (R, 1)  f32      linear-path scale (stride for x/y, 1 for obj/cls, 0 for w/h)
    out_ref   : VMEM (chunk, R, tGG)  decoded predictions, input dtype
    """
    p = pred_ref[...].astype(jnp.float32)      # per-tile upcast (bf16 stays bf16 on the HBM wire)
    s = jax.nn.sigmoid(p)                      # module sigmoids every channel
    # exp runs full-tile (EUP slot; free filler while HBM-bound) and is gated
    # purely by the precomputed scales -> no iota / compare / select.
    dec = jnp.exp(s) * escale_ref[...][None] + s * lscale_ref[...][None] + off_ref[...][None]
    out_ref[...] = dec.astype(out_ref.dtype)


def _round_up(x, m):
    return (x + m - 1) // m * m


def _legal_lane_tiles(gg):
    """Lane tiles satisfying Mosaic's block rule: multiple of 128, or the full dim."""
    tiles = [gg]
    if gg % 128 == 0:
        tiles += [d for d in range(128, gg, 128) if gg % d == 0]
    return sorted(set(tiles), reverse=True)       # big -> small


def _choose_tiling(n, rows, gg, in_itemsize, out_itemsize, block_cap_bytes=4 << 20):
    """Pick (batch_chunk, lane_tile, vmem_limit_bytes).

    Accounts for sublane padding (f32 pads rows to 8, bf16 to 16) and the 2x
    double-buffering of both the pred and out blocks; keeps the block set
    under `block_cap_bytes` (measured data shows ~1 MiB tiles already reach
    >=85% of HBM roofline) and prefers >=2 total grid steps so v7x megacore
    gets both TensorCores busy.
    """
    r_in = _round_up(rows, 8 * (4 // in_itemsize))
    r_out = _round_up(rows, 8 * (4 // out_itemsize))
    r_f32 = _round_up(rows, 8)
    per_lane = 2 * (r_in * in_itemsize + r_out * out_itemsize)   # dbl-buffered pred+out per lane col

    lane_tiles = _legal_lane_tiles(gg)
    tgg = lane_tiles[-1]
    for t in lane_tiles:                       # largest legal tile fitting the cap at chunk=1
        if per_lane * t <= block_cap_bytes:
            tgg = t
            break
    gg_steps = gg // tgg

    chunk = 1
    for c in sorted((d for d in range(1, n + 1) if n % d == 0), reverse=True):
        if c * per_lane * tgg > block_cap_bytes:
            continue
        if n >= 2 and gg_steps * (n // c) < 2:   # keep >=2 steps for megacore
            continue
        chunk = c
        break

    # If the whole problem collapsed to one grid step (e.g. N=1), split GG
    # once when legal so both v7x TensorCores get work.
    if gg_steps * (n // chunk) < 2 and len(lane_tiles) > 1:
        tgg = lane_tiles[1]
        gg_steps = gg // tgg

    # True footprint: double-buffered pred/out blocks + double-buffered off
    # block + tiny scale blocks; 2x margin for Mosaic internals.
    footprint = chunk * per_lane * tgg + 2 * r_f32 * 4 * tgg + 4 * r_f32 * 4
    vmem_limit = int(min(max(2 * footprint, 8 << 20), 48 << 20))
    return chunk, tgg, vmem_limit


def yolo_layer_forward(x, anchors, classes, image_size):
    """x: (N, A*(classes+5), G, G) NCHW raw conv output (f32 or bf16).

    Returns (output, 0) where output has shape (N, A*G*G, classes+5) and the
    dtype of `x`, matching PyTorch YOLOLayer.forward with target=None.
    """
    N, C, G, G2 = x.shape
    assert G == G2
    A = int(anchors.shape[0])
    C5 = classes + 5
    assert C == A * C5
    GG = G * G
    R = A * C5
    stride = float(image_size) / float(G)

    pred = x.reshape(N, R, GG)     # contiguous reshape; native dtype on the HBM wire

    # Precomputed per-row decode constants with stride/anchors folded in:
    #   decoded = exp(sig(p)) * exp_scale + sig(p) * lin_scale + off
    # row r = a*C5 + c:
    #   c==0: lin=stride, off=gx*stride     c==1: lin=stride, off=gy*stride
    #   c==2: exp=anchor_w[a]               c==3: exp=anchor_h[a]
    #   c>=4: lin=1 (plain sigmoid)
    # (exp(sig)*(a/stride)*stride == exp(sig)*a, so the anchor is used directly.)
    gx = jnp.tile(jnp.arange(G, dtype=jnp.float32), G) * stride
    gy = jnp.repeat(jnp.arange(G, dtype=jnp.float32), G) * stride
    off_c = jnp.zeros((C5, GG), jnp.float32).at[0].set(gx).at[1].set(gy)
    off = jnp.broadcast_to(off_c[None], (A, C5, GG)).reshape(R, GG)

    anc = anchors.astype(jnp.float32)                                   # (A, 2)
    exp_scale = jnp.zeros((A, C5), jnp.float32)
    exp_scale = exp_scale.at[:, 2].set(anc[:, 0]).at[:, 3].set(anc[:, 1])
    exp_scale = exp_scale.reshape(R, 1)
    lin_c = jnp.ones((C5,), jnp.float32)
    lin_c = lin_c.at[0].set(stride).at[1].set(stride).at[2].set(0.0).at[3].set(0.0)
    lin_scale = jnp.broadcast_to(lin_c[None], (A, C5)).reshape(R, 1)

    out_dtype = x.dtype
    chunk, tgg, vmem_limit = _choose_tiling(
        N, R, GG, x.dtype.itemsize, jnp.dtype(out_dtype).itemsize)

    # Grid order (gg_tile, batch): batch is the innermost (fastest) axis, so
    # the constant off/scale block indices are unchanged across the inner
    # sweep and Pallas skips their re-DMA.
    grid = (GG // tgg, N // chunk)

    out = pl.pallas_call(
        _yolo_decode_kernel,
        out_shape=jax.ShapeDtypeStruct((N, R, GG), out_dtype),
        grid_spec=pltpu.PrefetchScalarGridSpec(
            num_scalar_prefetch=0,
            grid=grid,
            in_specs=[
                pl.BlockSpec((chunk, R, tgg), lambda j, i: (i, 0, j)),  # pred chunk
                pl.BlockSpec((R, tgg), lambda j, i: (0, j)),            # folded grid offsets
                pl.BlockSpec((R, 1), lambda j, i: (0, 0)),              # exp-path scale
                pl.BlockSpec((R, 1), lambda j, i: (0, 0)),              # linear-path scale
            ],
            out_specs=pl.BlockSpec((chunk, R, tgg), lambda j, i: (i, 0, j)),
        ),
        compiler_params=pltpu.CompilerParams(
            dimension_semantics=("parallel", "parallel"),
            vmem_limit_bytes=vmem_limit),
    )(pred, off, exp_scale, lin_scale)

    # (N, R, GG) -> (N, A, GG, C5) -> (N, A*GG, C5): matches torch's
    # permute(0,1,3,4,2).view(N,-1,C5) flattening order (a, gy, gx).
    # Kept in the wrapper (kernel stores stay lane-dense on GG); for bf16 the
    # extra pass is half-width.  TODO(synk): fuse in-kernel for large,
    # 8/128-friendly C5.
    output = out.reshape(N, A, C5, GG).transpose(0, 1, 3, 2).reshape(N, A * GG, C5)
    return output, 0


def yolo_reference(x, anchors, classes, image_size):
    """Pure-JAX reference mirroring the PyTorch forward (target=None), in f32."""
    N, C, G, _ = x.shape
    A = anchors.shape[0]
    C5 = classes + 5
    stride = float(image_size) / float(G)
    pred = x.astype(jnp.float32).reshape(N, A, C5, G, G).transpose(0, 1, 3, 4, 2)
    s = jax.nn.sigmoid(pred)                                   # (N, A, G, G, C5)
    gx = jnp.arange(G, dtype=jnp.float32).reshape(1, 1, 1, G)
    gy = jnp.arange(G, dtype=jnp.float32).reshape(1, 1, G, 1)
    sa = anchors.astype(jnp.float32) / stride
    aw = sa[:, 0].reshape(1, A, 1, 1)
    ah = sa[:, 1].reshape(1, A, 1, 1)
    bx = s[..., 0] + gx
    by = s[..., 1] + gy
    bw = jnp.exp(s[..., 2]) * aw
    bh = jnp.exp(s[..., 3]) * ah
    boxes = jnp.stack([bx, by, bw, bh], axis=-1).reshape(N, -1, 4) * stride
    obj = s[..., 4].reshape(N, -1, 1)
    cls = s[..., 5:].reshape(N, -1, classes)
    return jnp.concatenate([boxes, obj, cls], axis=-1)


if __name__ == "__main__":
    # Small but representative YOLO head shapes.
    classes = 4                     # -> C5 = 9 channels per anchor, R = 27
    anchors = jnp.array([[10.0, 13.0], [16.0, 30.0], [33.0, 23.0]], dtype=jnp.float32)
    A = anchors.shape[0]
    image_size = 64                 # stride = 4.0 for G=16
    C = A * (classes + 5)           # 27

    # Test 1: f32, N=2, G=16 — exercises the >=2-batch-step (megacore) path.
    N, G = 2, 16
    x = jax.random.normal(jax.random.PRNGKey(0), (N, C, G, G), dtype=jnp.float32)
    out, loss = yolo_layer_forward(x, anchors, classes, image_size)
    out = jax.block_until_ready(out)
    ref = yolo_reference(x, anchors, classes, image_size)
    assert out.shape == (N, A * G * G, classes + 5), out.shape
    assert out.dtype == jnp.float32
    assert jnp.allclose(out, ref, atol=1e-5, rtol=1e-5), float(jnp.max(jnp.abs(out - ref)))

    # Test 2: bf16 in -> bf16 out (half the HBM traffic), N=1 exercises the
    # GG lane-split path (two 128-lane tiles) used for single-sample serving.
    xb = jax.random.normal(jax.random.PRNGKey(1), (1, C, G, G), dtype=jnp.bfloat16)
    outb, _ = yolo_layer_forward(xb, anchors, classes, image_size)
    outb = jax.block_until_ready(outb)
    refb = yolo_reference(xb, anchors, classes, image_size)
    assert outb.shape == (1, A * G * G, classes + 5), outb.shape
    assert outb.dtype == jnp.bfloat16
    err = float(jnp.max(jnp.abs(outb.astype(jnp.float32) - refb)))
    assert jnp.allclose(outb.astype(jnp.float32), refb, atol=1e-2, rtol=1e-2), err

    print("KERNEL_OK")
</pallas_src>

<mosaic_0001>
module attributes {stable_mosaic.version = 11 : i64} {
  func.func @_yolo_decode_kernel(%arg0: i32, %arg1: i32, %arg2: memref<1x27x256xf32, #tpu.memory_space<vmem>>, %arg3: memref<27x256xf32, #tpu.memory_space<vmem>>, %arg4: memref<27x1xf32, #tpu.memory_space<vmem>>, %arg5: memref<27x1xf32, #tpu.memory_space<vmem>>, %arg6: memref<1x27x256xf32, #tpu.memory_space<vmem>>) attributes {dimension_semantics = [#tpu.dimension_semantics<parallel>, #tpu.dimension_semantics<parallel>], iteration_bounds = array<i64: 1, 2>, scalar_prefetch = 0 : i64, scratch_operands = 0 : i64, tpu.core_type = #tpu.core_type<tc>, window_params = [{transform_indices = @transform_0, window_bounds = array<i64: 1, 27, 256>}, {transform_indices = @transform_1, window_bounds = array<i64: 27, 256>}, {pipeline_mode = #tpu.pipeline_mode<synchronous>, transform_indices = @transform_2, window_bounds = array<i64: 27, 1>}, {pipeline_mode = #tpu.pipeline_mode<synchronous>, transform_indices = @transform_3, window_bounds = array<i64: 27, 1>}, {transform_indices = @transform_4, window_bounds = array<i64: 1, 27, 256>}]} {
    %c0 = arith.constant 0 : index
    %c0_0 = arith.constant 0 : index
    %c0_1 = arith.constant 0 : index
    %0 = vector.load %arg2[%c0, %c0_0, %c0_1] : memref<1x27x256xf32, #tpu.memory_space<vmem>>, vector<1x27x256xf32>
    %1 = arith.negf %0 : vector<1x27x256xf32>
    %2 = math.exp %1 : vector<1x27x256xf32>
    %cst = arith.constant 1.000000e+00 : f32
    %3 = vector.broadcast %cst : f32 to vector<1x27x256xf32>
    %4 = arith.addf %3, %2 : vector<1x27x256xf32>
    %5 = arith.divf %3, %4 : vector<1x27x256xf32>
    %6 = math.exp %5 : vector<1x27x256xf32>
    %c0_2 = arith.constant 0 : index
    %c0_3 = arith.constant 0 : index
    %7 = vector.load %arg4[%c0_2, %c0_3] : memref<27x1xf32, #tpu.memory_space<vmem>>, vector<27x1xf32>
    %8 = vector.shape_cast %7 : vector<27x1xf32> to vector<1x27x1xf32>
    %9 = vector.broadcast %8 : vector<1x27x1xf32> to vector<1x27x256xf32>
    %10 = arith.mulf %6, %9 : vector<1x27x256xf32>
    %c0_4 = arith.constant 0 : index
    %c0_5 = arith.constant 0 : index
    %11 = vector.load %arg5[%c0_4, %c0_5] : memref<27x1xf32, #tpu.memory_space<vmem>>, vector<27x1xf32>
    %12 = vector.shape_cast %11 : vector<27x1xf32> to vector<1x27x1xf32>
    %13 = vector.broadcast %12 : vector<1x27x1xf32> to vector<1x27x256xf32>
    %14 = arith.mulf %5, %13 : vector<1x27x256xf32>
    %15 = arith.addf %10, %14 : vector<1x27x256xf32>
    %c0_6 = arith.constant 0 : index
    %c0_7 = arith.constant 0 : index
    %16 = vector.load %arg3[%c0_6, %c0_7] : memref<27x256xf32, #tpu.memory_space<vmem>>, vector<27x256xf32>
    %17 = vector.shape_cast %16 : vector<27x256xf32> to vector<1x27x256xf32>
    %18 = arith.addf %15, %17 : vector<1x27x256xf32>
    %c0_8 = arith.constant 0 : index
    %c0_9 = arith.constant 0 : index
    %c0_10 = arith.constant 0 : index
    %19 = vector.load %arg6[%c0_8, %c0_9, %c0_10] : memref<1x27x256xf32, #tpu.memory_space<vmem>>, vector<1x27x256xf32>
    tpu.vector_store %arg6[%c0_8, %c0_9, %c0_10], %18 {strides = array<i32>} : memref<1x27x256xf32, #tpu.memory_space<vmem>>, vector<1x27x256xf32>,
    return
  }
  func.func @transform_0(%arg0: i32, %arg1: i32) -> (i32, i32, i32) {
    %c0_i32 = arith.constant 0 : i32
    %c0_i32_0 = arith.constant 0 : i32
    return %arg1, %c0_i32, %arg0 : i32, i32, i32
  }
  func.func @transform_1(%arg0: i32, %arg1: i32) -> (i32, i32) {
    %c0_i32 = arith.constant 0 : i32
    %c0_i32_0 = arith.constant 0 : i32
    return %c0_i32, %arg0 : i32, i32
  }
  func.func @transform_2(%arg0: i32, %arg1: i32) -> (i32, i32) {
    %c0_i32 = arith.constant 0 : i32
    %c0_i32_0 = arith.constant 0 : i32
    %c0_i32_1 = arith.constant 0 : i32
    return %c0_i32, %c0_i32_0 : i32, i32
  }
  func.func @transform_3(%arg0: i32, %arg1: i32) -> (i32, i32) {
    %c0_i32 = arith.constant 0 : i32
    %c0_i32_0 = arith.constant 0 : i32
    %c0_i32_1 = arith.constant 0 : i32
    return %c0_i32, %c0_i32_0 : i32, i32
  }
  func.func @transform_4(%arg0: i32, %arg1: i32) -> (i32, i32, i32) {
    %c0_i32 = arith.constant 0 : i32
    %c0_i32_0 = arith.constant 0 : i32
    return %arg1, %c0_i32, %arg0 : i32, i32, i32
  }
}

</mosaic_0001>

<bundles_post_ra>
// kernel: tpu_custom_call.1
= control target key start
LH: loop header
LB: loop body
LE: loop exit
PB: predicated region body
PF: predicated region fallthrough
CT: control target
= control target key end

     0   :  { %s676_s15 = smov 0   ;;  %s678_s16 = smov 0   ;;  %s772_s0 = inlined_call_operand.vmem [shape: f32[2,27,256], index: 0, kind: input, shape index: {}]   ;;  %s773_s1 = inlined_call_operand.vmem [shape: f32[27,256], index: 1, kind: input, shape index: {}]   ;;  %s774_s2 = inlined_call_operand.vmem [shape: f32[27,1], index: 2, kind: input, shape index: {}]   ;;  %s775_s3 = inlined_call_operand.vmem [shape: f32[27,1], index: 3, kind: input, shape index: {}]   ;;  %s776_s4 = inlined_call_operand.vmem [shape: f32[2,27,256], index: 4, kind: output, shape index: {}]  }
   0x1   :  { %s680_s17 = smov 0  }
   0x2 LB: > { %s23_s18 = sadd.s32 1, %s644_s16  ;;  %p534_p0 = scmp.ge.s32.totalorder %s648_s17, 1  ;;  %s648_s17 = sphi %s680_s17, %s14_s17   ;;  %s644_s16 = sphi %s678_s16, %s778_s16   ;;  %s640_s15 = sphi %s676_s15, %s777_s15  }
   0x3   : > { %p24_p1 = scmp.ge.s32.totalorder %s23_s18, 2  ;;  %p194_p2 = scmp.lt.s32.totalorder %s648_s17, 3 }
   0x5   : > { %s780_s18 = smov (%p24_p1, %s23_s18), 0  ;;  %p195_p3 = pnand %p534_p0, %p194_p2 }
   0x6   : > { %v333_v0 = vld [vmem:[%s774_s2 + $0x10] sm:$0xff] (!%p195_p3)  ;;  %v331_v1 = vld [vmem:[%s774_s2] sm:$0xff] (!%p195_p3)  ;;  %v650_v2 = vmov (!%p195_p3), 0   ;;  %v334_v3 = vld [vmem:[%s774_s2 + $0x18] sm:$0x7] (!%p195_p3)  ;;  %p234_p4 = scmp.lt.s32.totalorder (!%p195_p3), %s640_s15, 1 }
   0x7   : > { %198 = sbr.rel (%p195_p3) target bundleno = 157 (0x9d), region = 36  ;;  %577 = vset.pattern.permute.xlu1 (!%p195_p3), %v650_v2  ;;  %576 = vset.pattern.permute.xlu0 (!%p195_p3), %v650_v2  ;;  %v332_v4 = vld [vmem:[%s774_s2 + $0x8] sm:$0xff] (!%p195_p3)  ;;  %v363_v6 = vld [vmem:[%s775_s3] sm:$0xff] (!%p195_p3)  ;;  %v366_v7 = vld [vmem:[%s775_s3 + $0x18] sm:$0x7] (!%p195_p3) }
   0x8   : > { %347 = vperm.xlu1 (!%p195_p3), %577, %v333_v0   ;;  %337 = vperm.xlu0 (!%p195_p3), %576, %v331_v1   ;;  %v364_v5 = vld [vmem:[%s775_s3 + $0x8] sm:$0xff] (!%p195_p3)  ;;  %v365_v8 = vld [vmem:[%s775_s3 + $0x10] sm:$0xff] (!%p195_p3) }
   0xc   : > { %352 = vperm.xlu1 (!%p195_p3), %577, %v334_v3   ;;  %342 = vperm.xlu0 (!%p195_p3), %576, %v332_v4  }
   0xe   : > { %s782_s15 = smov (!%p234_p4, %s640_s15), 1 }
   0xf   : > { %s549_s9 = sshll.u32 %s782_s15, 6 }
  0x10   : > { %374 = vperm.xlu1 %577, %v364_v5   ;;  %369 = vperm.xlu0 %576, %v363_v6   ;;  %s241_s12 = scalar_lea.vmem %s772_s0, %s549_s9  ;;  %s257_s27 = scalar_lea.vmem %s776_s4, %s549_s9 }
  0x11   : > { %v259_v9 = vld [vmem:[%s241_s12] sm:$0xff]  ;;  %v260_v10 = vld [vmem:[%s241_s12 + $0x8] sm:$0xff]  ;;  %v261_v11 = vld [vmem:[%s241_s12 + $0x10] sm:$0xff] }
  0x12   : > { %v539_v12 = vmul.f32 -1.442695, %v259_v9  ;;  %v262_v13 = vld [vmem:[%s241_s12 + $0x18] sm:$0xff]  ;;  %v263_v14 = vld [vmem:[%s241_s12 + $0x20] sm:$0xff]  ;;  %v540_v15 = vmul.f32 -1.442695, %v260_v10 }
  0x13   : > { %v264_v16 = vld [vmem:[%s241_s12 + $0x28] sm:$0xff]  ;;  %v541_v17 = vmul.f32 -1.442695, %v261_v11  ;;  %v265_v18 = vld [vmem:[%s241_s12 + $0x30] sm:$0x7] }
  0x14   : > { %384 = vperm.xlu1 %577, %v366_v7   ;;  %379 = vperm.xlu0 %576, %v365_v8   ;;  %v542_v19 = vmul.f32 -1.442695, %v262_v13  ;;  %v543_v20 = vmul.f32 -1.442695, %v263_v14  ;;  %578 = vpow2.f32 %v539_v12  ;;  %v266_v21 = vld [vmem:[%s241_s12 + $0x38] sm:$0x7] }
  0x15   : > { %v544_v22 = vmul.f32 -1.442695, %v264_v16  ;;  %580 = vpow2.f32 %v540_v15  ;;  %v545_v23 = vmul.f32 -1.442695, %v265_v18  ;;  %v546_v24 = vmul.f32 -1.442695, %v266_v21 }
  0x16   : > { %582 = vpow2.f32 %v541_v17  ;;  %v405_v11 = vld [vmem:[%s773_s1 + $0x10] sm:$0xff]  ;;  %v406_v16 = vld [vmem:[%s773_s1 + $0x18] sm:$0xff]  ;;  %v403_v17 = vld [vmem:[%s773_s1] sm:$0xff] }
  0x17   : > { %584 = vpow2.f32 %v542_v19  ;;  %v404_v18 = vld [vmem:[%s773_s1 + $0x8] sm:$0xff] }
  0x18   : > { %586 = vpow2.f32 %v543_v20 }
  0x19   : > { %588 = vpow2.f32 %v544_v22 }
  0x1a   : > { %590 = vpow2.f32 %v545_v23 }
  0x1b   : > { %592 = vpow2.f32 %v546_v24 }
  0x1e   : > { %v579_v25 = vpop.eup %578 }
  0x1f   : > { %v581_v26 = vpop.eup %580  ;;  %v291_v29 = vadd.f32 1.0, %v579_v25 }
  0x20   : > { %v583_v27 = vpop.eup %582  ;;  %v292_v31 = vadd.f32 1.0, %v581_v26 }
  0x21   : > { %v585_v28 = vpop.eup %584  ;;  %v293_v33 = vadd.f32 1.0, %v583_v27  ;;  %594 = vrcp.f32 %v291_v29 }
  0x22   : > { %v587_v30 = vpop.eup %586  ;;  %v294_v35 = vadd.f32 1.0, %v585_v28  ;;  %596 = vrcp.f32 %v292_v31 }
  0x23   : > { %v589_v32 = vpop.eup %588  ;;  %v295_v37 = vadd.f32 1.0, %v587_v30  ;;  %598 = vrcp.f32 %v293_v33  ;;  %v409_v33 = vld [vmem:[%s773_s1 + $0x30] sm:$0x7] }
  0x24   : > { %v591_v34 = vpop.eup %590  ;;  %v296_v38 = vadd.f32 1.0, %v589_v32  ;;  %600 = vrcp.f32 %v294_v35 }
  0x25   : > { %v593_v36 = vpop.eup %592  ;;  %v297_v39 = vadd.f32 1.0, %v591_v34  ;;  %602 = vrcp.f32 %v295_v37 }
  0x26   : > { %v298_v40 = vadd.f32 1.0, %v593_v36  ;;  %604 = vrcp.f32 %v296_v38  ;;  %v410_v38 = vld [vmem:[%s773_s1 + $0x38] sm:$0x7] }
  0x27   : > { %606 = vrcp.f32 %v297_v39  ;;  %v407_v39 = vld [vmem:[%s773_s1 + $0x20] sm:$0xff] }
  0x28   : > { %608 = vrcp.f32 %v298_v40  ;;  %v408_v40 = vld [vmem:[%s773_s1 + $0x28] sm:$0xff] }
  0x2b   : > { %v595_v41 = vpop.eup %594 }
  0x2c   : > { %v597_v42 = vpop.eup %596  ;;  %v315_v45 = vmul.f32 1.442695, %v595_v41 }
  0x2d   : > { %v599_v43 = vpop.eup %598  ;;  %v317_v47 = vmul.f32 1.442695, %v597_v42 }
  0x2e   : > { %v601_v44 = vpop.eup %600  ;;  %v319_v49 = vmul.f32 1.442695, %v599_v43  ;;  %610 = vpow2.f32 %v315_v45 }
  0x2f   : > { %v730_v46 = vpop.eup %602  ;;  %v321_v51 = vmul.f32 1.442695, %v601_v44  ;;  %612 = vpow2.f32 %v317_v47 }
  0x30   : > { %v605_v48 = vpop.eup %604  ;;  %v323_v53 = vmul.f32 1.442695, %v730_v46  ;;  %614 = vpow2.f32 %v319_v49 }
  0x31   : > { %v607_v50 = vpop.eup %606  ;;  %v325_v54 = vmul.f32 1.442695, %v605_v48  ;;  %616 = vpow2.f32 %v321_v51 }
  0x32   : > { %v609_v52 = vpop.eup %608  ;;  %v327_v55 = vmul.f32 1.442695, %v607_v50  ;;  %618 = vpow2.f32 %v323_v53 }
  0x33   : > { %v329_v56 = vmul.f32 1.442695, %v609_v52  ;;  %620 = vpow2.f32 %v325_v54 }
  0x34   : > { %622 = vpow2.f32 %v327_v55 }
  0x35   : > { %624 = vpow2.f32 %v329_v56 }
  0x38   : > { %v611_v59 = vpop.eup %610 }
  0x39   : > { %v613_v60 = vpop.eup %612 }
  0x3a   : > { %v615_v61 = vpop.eup %614 }
  0x3b   : > { %v617_v0 = vpop.eup %616 }
  0x3c   : > { %v619_v1 = vpop.eup %618 }
  0x3d   : > { %v621_v2 = vpop.eup %620 }
  0x3e   : > { %v623_v3 = vpop.eup %622 }
  0x3f   : > { %v625_v10 = vpop.eup %624 }
  0x87   : > { %v348_v57 = vpop.permute.xlu1 %347  ;;  %v338_v58 = vpop.permute.xlu0 %337 }
  0x88   : > { %v355_v4 = vmul.f32 %v611_v59, %v338_v58  ;;  %v356_v5 = vmul.f32 %v613_v60, %v338_v58  ;;  %v359_v23 = vmul.f32 %v619_v1, %v348_v57  ;;  %v360_v24 = vmul.f32 %v621_v2, %v348_v57 }
  0x8b   : > { %v353_v62 = vpop.permute.xlu1 %352  ;;  %v343_v63 = vpop.permute.xlu0 %342 }
  0x8c   : > { %v357_v6 = vmul.f32 %v615_v61, %v343_v63  ;;  %v358_v7 = vmul.f32 %v617_v0, %v343_v63  ;;  %v361_v25 = vmul.f32 %v623_v3, %v353_v62  ;;  %v362_v26 = vmul.f32 %v625_v10, %v353_v62 }
  0x8f   : > { %v375_v8 = vpop.permute.xlu1 %374  ;;  %v370_v9 = vpop.permute.xlu0 %369 }
  0x90   : > { %v389_v12 = vmul.f32 %v599_v43, %v375_v8  ;;  %v390_v13 = vmul.f32 %v601_v44, %v375_v8  ;;  %v387_v14 = vmul.f32 %v595_v41, %v370_v9  ;;  %v388_v15 = vmul.f32 %v597_v42, %v370_v9 }
  0x92   : > { %v397_v19 = vadd.f32 %v389_v12, %v357_v6  ;;  %v398_v20 = vadd.f32 %v390_v13, %v358_v7  ;;  %v395_v21 = vadd.f32 %v387_v14, %v355_v4  ;;  %v396_v22 = vadd.f32 %v388_v15, %v356_v5 }
  0x93   : > { %v385_v27 = vpop.permute.xlu1 %384  ;;  %v380_v28 = vpop.permute.xlu0 %379 }
  0x94   : > { %v413_v29 = vadd.f32 %v405_v11, %v397_v19  ;;  %v414_v30 = vadd.f32 %v406_v16, %v398_v20  ;;  %v411_v31 = vadd.f32 %v403_v17, %v395_v21  ;;  %v412_v32 = vadd.f32 %v404_v18, %v396_v22 }
  0x95   : > { %v393_v34 = vmul.f32 %v607_v50, %v385_v27  ;;  %v394_v35 = vmul.f32 %v609_v52, %v385_v27  ;;  %v391_v36 = vmul.f32 %v730_v46, %v380_v28  ;;  %v392_v37 = vmul.f32 %v605_v48, %v380_v28 }
  0x96   : > { %421 = vst [vmem:[%s257_s27 + $0x10] sm:$0xff] %v413_v29  ;;  %422 = vst [vmem:[%s257_s27 + $0x18] sm:$0xff] %v414_v30 }
  0x97   : > { %419 = vst [vmem:[%s257_s27] sm:$0xff] %v411_v31  ;;  %420 = vst [vmem:[%s257_s27 + $0x8] sm:$0xff] %v412_v32  ;;  %v401_v41 = vadd.f32 %v393_v34, %v361_v25  ;;  %v402_v42 = vadd.f32 %v394_v35, %v362_v26  ;;  %v399_v43 = vadd.f32 %v391_v36, %v359_v23 }
  0x98   : > { %v400_v44 = vadd.f32 %v392_v37, %v360_v24 }
  0x99   : > { %v417_v45 = vadd.f32 %v409_v33, %v401_v41  ;;  %v418_v46 = vadd.f32 %v410_v38, %v402_v42  ;;  %v415_v47 = vadd.f32 %v407_v39, %v399_v43 }
  0x9a   : > { %v416_v48 = vadd.f32 %v408_v40, %v400_v44 }
  0x9b   : > { %425 = vst [vmem:[%s257_s27 + $0x30] sm:$0x7] %v417_v45  ;;  %426 = vst [vmem:[%s257_s27 + $0x38] sm:$0x7] %v418_v46 }
  0x9c   : > { %423 = vst [vmem:[%s257_s27 + $0x20] sm:$0xff] %v415_v47  ;;  %424 = vst [vmem:[%s257_s27 + $0x28] sm:$0xff] %v416_v48 }
  0x9d PF: > { %s14_s17 = sadd.s32 1, %s648_s17   ;;  %s777_s15 = smov %s644_s16 }
  0x9e   : > { %p11_p5 = scmp.ge.s32.totalorder %s14_s17, 4   ;;  %s778_s16 = smov %s780_s18 }
  0xa0   :  { %13 = sbr.rel (!%p11_p5) target bundleno = 2 (0x2), region = 69 }

</bundles_post_ra>
